<compile_context>
chip_gen: v5e
topology: v5e:2x2
jax: 0.10.0
libtpu: 0.0.40
codegen_flags: <defaults>
</compile_context>

<pallas_src>
import functools

import jax
import jax.numpy as jnp
from jax.experimental import pallas as pl
from jax.experimental.pallas import tpu as pltpu


def _vq_kernel(z_ref, emb_ref, esq_ref, zq_ref, idx_ref, losspart_ref, *,
               n_e_pad, m_valid, mask_rows):
    tm, c = z_ref.shape

    z = z_ref[...]            # (tm, C)   float32
    emb = emb_ref[...]        # (n_e_pad, C) float32 (padded rows are zeros)
    e_sq = esq_ref[...]       # (1, n_e_pad) float32 (padded entries = +huge)

    # ||z||^2 per row; ||e||^2 was hoisted to the wrapper and passed in.
    z_sq = jnp.sum(z * z, axis=1, keepdims=True)                       # (tm, 1)

    # -2 * z . e^T, transpose-free: contract the last dim of both operands so
    # the codebook is consumed in its native (n_e, e_dim) layout.
    cross = jax.lax.dot_general(
        z, emb,
        dimension_numbers=(((1,), (1,)), ((), ())),
        preferred_element_type=jnp.float32)                            # (tm, n_e_pad)
    d = z_sq + e_sq - 2.0 * cross

    # argmin along the codebook (lane) axis; first index on ties.
    min_d = jnp.min(d, axis=1, keepdims=True)                          # (tm, 1)
    col = jax.lax.broadcasted_iota(jnp.int32, d.shape, 1)              # (tm, n_e_pad)
    idx = jnp.min(jnp.where(d <= min_d, col, n_e_pad), axis=1)         # (tm,)
    idx_ref[...] = idx[:, None].astype(jnp.int32)

    # Gather codebook rows via one-hot @ embedding (MXU-friendly gather).
    onehot = (col == idx[:, None]).astype(jnp.float32)                 # (tm, n_e_pad)
    z_q = jnp.dot(onehot, emb, preferred_element_type=jnp.float32)     # (tm, C)
    zq_ref[...] = z_q.astype(zq_ref.dtype)

    # Per-tile partial loss.  Fold rows 8-at-a-time with pure VPU adds; the
    # final cross-lane reduction is done in the wrapper, so there is no carried
    # accumulator and the grid axis can stay "parallel".
    diff = z_q - z
    sq = diff * diff
    if mask_rows:
        row = (jax.lax.broadcasted_iota(jnp.int32, sq.shape, 0)
               + pl.program_id(0) * tm)
        sq = jnp.where(row < m_valid, sq, 0.0)
    acc = sq[0:8, :]
    for r in range(1, tm // 8):
        acc = acc + sq[r * 8:(r + 1) * 8, :]
    losspart_ref[...] = acc                                            # (8, C)


def _round_up(x, m):
    return (x + m - 1) // m * m


def vector_quantizer(z, embedding, beta=0.25, tm=256):
    """z: (B, N, C) float32, embedding: (n_e, e_dim) float32, C == e_dim.

    tm: M-tile size. 256 is a good default on v6e/v7x; use 128 on v5e.
    """
    B, N, C = z.shape
    n_e, e_dim = embedding.shape
    assert C == e_dim
    M = B * N

    # Tile / padding bookkeeping.
    tm_eff = _round_up(min(tm, _round_up(M, 8)), 8)
    M_pad = _round_up(M, tm_eff)
    n_e_pad = _round_up(n_e, 128)
    num_tiles = M_pad // tm_eff

    z_flat = z.reshape(M, C).astype(jnp.float32)
    if M_pad != M:
        z_flat = jnp.pad(z_flat, ((0, M_pad - M), (0, 0)))

    emb = embedding.astype(jnp.float32)
    if n_e_pad != n_e:
        emb = jnp.pad(emb, ((0, n_e_pad - n_e), (0, 0)))

    # Hoisted codebook norms; padded rows get a huge norm so they never win.
    e_sq = jnp.sum(emb * emb, axis=1)
    e_sq = jnp.where(jnp.arange(n_e_pad) < n_e, e_sq, jnp.float32(1e30))
    e_sq = e_sq[None, :]                                               # (1, n_e_pad)

    loss_scale = (1.0 + beta) / float(M * C)

    kernel = functools.partial(
        _vq_kernel, n_e_pad=n_e_pad, m_valid=M, mask_rows=(M_pad != M))

    # Rough VMEM budget (bytes): z/z_q tiles (double-buffered), resident
    # codebook + norms, and the (tm, n_e_pad) distance / one-hot temporaries.
    # TODO(synk): for very large codebooks (n_e*e_dim*4 approaching the scoped
    # VMEM limit, esp. on v7x's 64 MiB), chunk n_e on a second grid axis.
    est_vmem = 4 * (4 * tm_eff * C + n_e_pad * (C + 1) + 3 * tm_eff * n_e_pad)
    vmem_limit = est_vmem + (16 << 20) if est_vmem > (28 << 20) else None

    zq_flat, idx2d, loss_parts = pl.pallas_call(
        kernel,
        out_shape=(
            jax.ShapeDtypeStruct((M_pad, C), z.dtype),        # z_q (flattened)
            jax.ShapeDtypeStruct((M_pad, 1), jnp.int32),      # indices
            jax.ShapeDtypeStruct((num_tiles, 8, C), jnp.float32),  # loss partials
        ),
        grid_spec=pltpu.PrefetchScalarGridSpec(
            num_scalar_prefetch=0,
            grid=(num_tiles,),
            in_specs=[
                pl.BlockSpec((tm_eff, C), lambda i: (i, 0)),       # z tile
                pl.BlockSpec((n_e_pad, C), lambda i: (0, 0)),      # codebook (resident)
                pl.BlockSpec((1, n_e_pad), lambda i: (0, 0)),      # ||e||^2 (resident)
            ],
            out_specs=[
                pl.BlockSpec((tm_eff, C), lambda i: (i, 0)),
                pl.BlockSpec((tm_eff, 1), lambda i: (i, 0)),
                pl.BlockSpec((None, 8, C), lambda i: (i, 0, 0)),
            ],
        ),
        compiler_params=pltpu.CompilerParams(
            dimension_semantics=("parallel",),   # no carried state -> megacore OK
            vmem_limit_bytes=vmem_limit,
        ),
    )(z_flat, emb, e_sq)

    z_q = zq_flat[:M].reshape(B, N, C)
    indices = idx2d[:M, 0]
    loss = jnp.sum(loss_parts) * jnp.float32(loss_scale)
    return z_q, loss, indices


def _reference(z, embedding, beta=0.25):
    B, N, C = z.shape
    zf = z.reshape(-1, C)
    d = (jnp.sum(zf ** 2, axis=1, keepdims=True)
         + jnp.sum(embedding ** 2, axis=1)
         - 2.0 * zf @ embedding.T)
    idx = jnp.argmin(d, axis=1)
    z_q = embedding[idx].reshape(z.shape)
    loss = jnp.mean((z_q - z) ** 2) + beta * jnp.mean((z_q - z) ** 2)
    return z_q, loss, idx


if __name__ == "__main__":
    n_e, e_dim, beta = 16, 32, 0.25
    B, N = 2, 8

    key = jax.random.PRNGKey(0)
    k_emb, k_z = jax.random.split(key)

    # nn.Embedding weight uniform_(-1/n_e, 1/n_e), deterministic init.
    embedding = jax.random.uniform(
        k_emb, (n_e, e_dim), jnp.float32, minval=-1.0 / n_e, maxval=1.0 / n_e)
    z = jax.random.normal(k_z, (B, N, e_dim), jnp.float32)

    z_q, loss, indices = vector_quantizer(z, embedding, beta=beta)
    jax.block_until_ready((z_q, loss, indices))

    # Cross-check against a pure-JAX reference.
    zq_ref, loss_ref, idx_ref = _reference(z, embedding, beta=beta)
    assert jnp.allclose(z_q, zq_ref, atol=1e-5), "z_q mismatch"
    assert jnp.allclose(loss, loss_ref, atol=1e-5), "loss mismatch"
    assert jnp.array_equal(indices, idx_ref.astype(jnp.int32)), "indices mismatch"

    print("KERNEL_OK")
</pallas_src>

<mosaic_0001>
module attributes {stable_mosaic.version = 11 : i64} {
  func.func @_vq_kernel(%arg0: i32, %arg1: memref<16x32xf32, #tpu.memory_space<vmem>>, %arg2: memref<128x32xf32, #tpu.memory_space<vmem>>, %arg3: memref<1x128xf32, #tpu.memory_space<vmem>>, %arg4: memref<16x32xf32, #tpu.memory_space<vmem>>, %arg5: memref<16x1xi32, #tpu.memory_space<vmem>>, %arg6: memref<1x8x32xf32, #tpu.memory_space<vmem>>) attributes {dimension_semantics = [#tpu.dimension_semantics<parallel>], iteration_bounds = array<i64: 1>, scalar_prefetch = 0 : i64, scratch_operands = 0 : i64, tpu.core_type = #tpu.core_type<tc>, window_params = [{transform_indices = @transform_0, window_bounds = array<i64: 16, 32>}, {pipeline_mode = #tpu.pipeline_mode<synchronous>, transform_indices = @transform_1, window_bounds = array<i64: 128, 32>}, {pipeline_mode = #tpu.pipeline_mode<synchronous>, transform_indices = @transform_2, window_bounds = array<i64: 1, 128>}, {transform_indices = @transform_3, window_bounds = array<i64: 16, 32>}, {transform_indices = @transform_4, window_bounds = array<i64: 16, 1>}, {transform_indices = @transform_5, window_bounds = array<i64: 1, 8, 32>}]} {
    %c0 = arith.constant 0 : index
    %c0_0 = arith.constant 0 : index
    %0 = vector.load %arg1[%c0, %c0_0] : memref<16x32xf32, #tpu.memory_space<vmem>>, vector<16x32xf32>
    %c0_1 = arith.constant 0 : index
    %c0_2 = arith.constant 0 : index
    %1 = vector.load %arg2[%c0_1, %c0_2] : memref<128x32xf32, #tpu.memory_space<vmem>>, vector<128x32xf32>
    %c0_3 = arith.constant 0 : index
    %c0_4 = arith.constant 0 : index
    %2 = vector.load %arg3[%c0_3, %c0_4] : memref<1x128xf32, #tpu.memory_space<vmem>>, vector<1x128xf32>
    %3 = arith.mulf %0, %0 : vector<16x32xf32>
    %cst = arith.constant dense<0.000000e+00> : vector<16xf32>
    %4 = vector.multi_reduction <add>, %3, %cst [1] : vector<16x32xf32> to vector<16xf32>
    %5 = vector.shape_cast %4 : vector<16xf32> to vector<16x1xf32>
    %cst_5 = arith.constant dense<0.000000e+00> : vector<16x128xf32>
    %6 = tpu.matmul %0, %1, %cst_5 {dimension_numbers = #tpu.dot_dimension_numbers<[1], [1], [0], [0], [0, 0, 1, 0], [], []>} : vector<16x32xf32>, vector<128x32xf32>, vector<16x128xf32> -> vector<16x128xf32>
    %7 = vector.broadcast %5 : vector<16x1xf32> to vector<16x128xf32>
    %8 = vector.broadcast %2 : vector<1x128xf32> to vector<16x128xf32>
    %9 = arith.addf %7, %8 : vector<16x128xf32>
    %cst_6 = arith.constant 2.000000e+00 : f32
    %10 = vector.broadcast %cst_6 : f32 to vector<16x128xf32>
    %11 = arith.mulf %10, %6 : vector<16x128xf32>
    %12 = arith.subf %9, %11 : vector<16x128xf32>
    %cst_7 = arith.constant dense<0x7F800000> : vector<16xf32>
    %13 = vector.multi_reduction <minimumf>, %12, %cst_7 [1] : vector<16x128xf32> to vector<16xf32>
    %14 = vector.shape_cast %13 : vector<16xf32> to vector<16x1xf32>
    %15 = tpu.iota {dimensions = array<i32: 1>} : vector<16x128xi32>
    %16 = vector.broadcast %14 : vector<16x1xf32> to vector<16x128xf32>
    %17 = arith.cmpf ole, %12, %16 : vector<16x128xf32>
    %c128_i32 = arith.constant 128 : i32
    %18 = vector.broadcast %c128_i32 : i32 to vector<16x128xi32>
    %19 = arith.select %17, %15, %18 : vector<16x128xi1>, vector<16x128xi32>
    %cst_8 = arith.constant dense<2147483647> : vector<16xi32>
    %20 = vector.multi_reduction <minsi>, %19, %cst_8 [1] : vector<16x128xi32> to vector<16xi32>
    %21 = vector.shape_cast %20 : vector<16xi32> to vector<16x1xi32>
    %c0_9 = arith.constant 0 : index
    %c0_10 = arith.constant 0 : index
    %22 = vector.load %arg5[%c0_9, %c0_10] : memref<16x1xi32, #tpu.memory_space<vmem>>, vector<16x1xi32>
    tpu.vector_store %arg5[%c0_9, %c0_10], %21 {strides = array<i32>} : memref<16x1xi32, #tpu.memory_space<vmem>>, vector<16x1xi32>,
    %23 = vector.shape_cast %20 : vector<16xi32> to vector<16x1xi32>
    %24 = vector.broadcast %23 : vector<16x1xi32> to vector<16x128xi32>
    %25 = arith.cmpi eq, %15, %24 : vector<16x128xi32>
    %26 = arith.extui %25 : vector<16x128xi1> to vector<16x128xi32>
    %27 = arith.sitofp %26 : vector<16x128xi32> to vector<16x128xf32>
    %cst_11 = arith.constant dense<0.000000e+00> : vector<16x32xf32>
    %28 = tpu.matmul %27, %1, %cst_11 {dimension_numbers = #tpu.dot_dimension_numbers<[1], [0], [0], [1], [0, 0, 1, 1], [], []>} : vector<16x128xf32>, vector<128x32xf32>, vector<16x32xf32> -> vector<16x32xf32>
    %c0_12 = arith.constant 0 : index
    %c0_13 = arith.constant 0 : index
    %29 = vector.load %arg4[%c0_12, %c0_13] : memref<16x32xf32, #tpu.memory_space<vmem>>, vector<16x32xf32>
    tpu.vector_store %arg4[%c0_12, %c0_13], %28 {strides = array<i32>} : memref<16x32xf32, #tpu.memory_space<vmem>>, vector<16x32xf32>,
    %30 = arith.subf %28, %0 : vector<16x32xf32>
    %31 = arith.mulf %30, %30 : vector<16x32xf32>
    %32 = vector.extract_strided_slice %31 {offsets = [0, 0], sizes = [8, 32], strides = [1, 1]} : vector<16x32xf32> to vector<8x32xf32>
    %33 = vector.extract_strided_slice %31 {offsets = [8, 0], sizes = [8, 32], strides = [1, 1]} : vector<16x32xf32> to vector<8x32xf32>
    %34 = arith.addf %32, %33 : vector<8x32xf32>
    %c0_14 = arith.constant 0 : index
    %c0_15 = arith.constant 0 : index
    %c0_16 = arith.constant 0 : index
    %35 = vector.load %arg6[%c0_14, %c0_15, %c0_16] : memref<1x8x32xf32, #tpu.memory_space<vmem>>, vector<1x8x32xf32>
    %36 = vector.shape_cast %35 : vector<1x8x32xf32> to vector<8x32xf32>
    %37 = vector.shape_cast %34 : vector<8x32xf32> to vector<1x8x32xf32>
    tpu.vector_store %arg6[%c0_14, %c0_15, %c0_16], %37 {strides = array<i32>} : memref<1x8x32xf32, #tpu.memory_space<vmem>>, vector<1x8x32xf32>,
    return
  }
  func.func @transform_0(%arg0: i32) -> (i32, i32) {
    %c0_i32 = arith.constant 0 : i32
    %c0_i32_0 = arith.constant 0 : i32
    return %arg0, %c0_i32 : i32, i32
  }
  func.func @transform_1(%arg0: i32) -> (i32, i32) {
    %c0_i32 = arith.constant 0 : i32
    %c0_i32_0 = arith.constant 0 : i32
    %c0_i32_1 = arith.constant 0 : i32
    return %c0_i32, %c0_i32_0 : i32, i32
  }
  func.func @transform_2(%arg0: i32) -> (i32, i32) {
    %c0_i32 = arith.constant 0 : i32
    %c0_i32_0 = arith.constant 0 : i32
    %c0_i32_1 = arith.constant 0 : i32
    return %c0_i32, %c0_i32_0 : i32, i32
  }
  func.func @transform_3(%arg0: i32) -> (i32, i32) {
    %c0_i32 = arith.constant 0 : i32
    %c0_i32_0 = arith.constant 0 : i32
    return %arg0, %c0_i32 : i32, i32
  }
  func.func @transform_4(%arg0: i32) -> (i32, i32) {
    %c0_i32 = arith.constant 0 : i32
    %c0_i32_0 = arith.constant 0 : i32
    return %arg0, %c0_i32 : i32, i32
  }
  func.func @transform_5(%arg0: i32) -> (i32, i32, i32) {
    %c0_i32 = arith.constant 0 : i32
    %c0_i32_0 = arith.constant 0 : i32
    %c0_i32_1 = arith.constant 0 : i32
    return %arg0, %c0_i32, %c0_i32_0 : i32, i32, i32
  }
}

</mosaic_0001>

<bundles_post_ra>
// kernel: tpu_custom_call.1
= control target key start
LH: loop header
LB: loop body
LE: loop exit
PB: predicated region body
PF: predicated region fallthrough
CT: control target
= control target key end

     0   :  { %11 = vsyncpa [#allocation3], 0  ;;  %vm40_vm0 = vcmask 261120   ;;  %s500_s0 = inlined_call_operand.vmem [shape: f32[16,32], index: 0, kind: input, shape index: {}]   ;;  %s501_s1 = inlined_call_operand.vmem [shape: f32[128,32], index: 1, kind: input, shape index: {}]   ;;  %s502_s2 = inlined_call_operand.vmem [shape: f32[1,128], index: 2, kind: input, shape index: {}]   ;;  %s503_s3 = inlined_call_operand.hbm [shape: f32[16,32], index: 3, kind: output, shape index: {0}]   ;;  %s504_s4 = inlined_call_operand.vmem [shape: s32[16,1], index: 4, kind: output, shape index: {1}]   ;;  %s505_s5 = inlined_call_operand.hbm [shape: f32[1,8,32], index: 5, kind: output, shape index: {2}]  }
   0x1   :  { %v36_v0 = vld [vmem:[%s501_s1 + $0x78] sm:$0xff]  ;;  %v35_v1 = vld [vmem:[%s501_s1 + $0x70] sm:$0xff] }
   0x2   :  { %249 = vmatpush.xpose.msk.msra.mxu0 %vm40_vm0, %v36_v0  ;;  %271 = vmatpush.xpose.msk.msra.mxu2 %vm40_vm0, %v36_v0 }
   0x3   :  { %180 = vmatpush.msra.mxu1 %v36_v0 }
   0x4   :  { %12 = vsyncpa [#allocation5], 0  ;;  %v34_v2 = vld [vmem:[%s501_s1 + $0x68] sm:$0xff]  ;;  %v33_v3 = vld [vmem:[%s501_s1 + $0x60] sm:$0xff]  ;;  %v137_v33 = vlaneseq  ;;  %vm171_vm5 = vcmask 7168   ;;  %v345_v57 = vmov 1.0  }
   0x5   :  { %181 = vmatpush.msra.mxu1 %v35_v1  ;;  %v32_v4 = vld [vmem:[%s501_s1 + $0x58] sm:$0xff]  ;;  %v31_v5 = vld [vmem:[%s501_s1 + $0x50] sm:$0xff]  ;;  %v30_v6 = vld [vmem:[%s501_s1 + $0x48] sm:$0xff]  ;;  %s346_s7 = smov [#allocation2]   ;;  %s217_s11 = sshll.u32 %s503_s3, 4  ;;  %s218_s11 = int_to_ptr.hbm [resolvable:$true] %s217_s11 }
   0x6   :  { %250 = vmatpush.xpose.msk.msra.mxu0 %vm40_vm0, %v35_v1  ;;  %272 = vmatpush.xpose.msk.msra.mxu2 %vm40_vm0, %v35_v1  ;;  %v29_v7 = vld [vmem:[%s501_s1 + $0x40] sm:$0xff]  ;;  %v28_v8 = vld [vmem:[%s501_s1 + $0x38] sm:$0xff]  ;;  %v27_v9 = vld [vmem:[%s501_s1 + $0x30] sm:$0xff]  ;;  %v138_v34 = vand.u32 127, %v137_v33  ;;  %s215_s8 = sshll.u32 %s346_s7, 4  ;;  %s233_s15 = sshll.u32 %s505_s5, 4  ;;  %s216_s8 = int_to_ptr.vmem [resolvable:$true] %s215_s8  ;;  %s234_s15 = int_to_ptr.hbm [resolvable:$true] %s233_s15 }
   0x7   :  { %182 = vmatpush.msra.mxu1 %v34_v2  ;;  %v26_v10 = vld [vmem:[%s501_s1 + $0x28] sm:$0xff]  ;;  %v25_v11 = vld [vmem:[%s501_s1 + $0x20] sm:$0xff]  ;;  %v24_v12 = vld [vmem:[%s501_s1 + $0x18] sm:$0xff]  ;;  %s348_s16 = smov 128   ;;  %s349_s17 = smov 8  }
   0x8   :  { %v23_v13 = vld [vmem:[%s501_s1 + $0x10] sm:$0xff]  ;;  %v22_v14 = vld [vmem:[%s501_s1 + $0x8] sm:$0xff]  ;;  %v21_v15 = vld [vmem:[%s501_s1] sm:$0xff] }
   0x9   :  { %183 = vmatpush.msra.mxu1 %v33_v3  ;;  %v447_v16 = vld [vmem:[%s500_s0] sm:$0xff]  ;;  %v457_v19 = vld [vmem:[%s500_s0 + $0x8] sm:$0xff] }
   0xa   :  { %251 = vmatpush.xpose.msk.msra.mxu0 %vm40_vm0, %v34_v2  ;;  %273 = vmatpush.xpose.msk.msra.mxu2 %vm40_vm0, %v34_v2  ;;  %v38_v17 = vmul.f32 %v447_v16, %v447_v16  ;;  %v39_v20 = vmul.f32 %v457_v19, %v457_v19  ;;  %v292_v23 = vld [vmem:[%s502_s2] ss:$0 sm:$0xff] }
   0xb   :  { %184 = vmatpush.msra.mxu1 %v32_v4 }
   0xc   :  { %v41_v18 = vsel %vm40_vm0, %v38_v17, 0.0  ;;  %v44_v21 = vsel %vm40_vm0, %v39_v20, 0.0 }
   0xd   :  { %185 = vmatpush.msra.mxu1 %v31_v5  ;;  %42 = vadd.xlane.f32.xlu0 %v41_v18 }
   0xe   :  { %252 = vmatpush.xpose.msk.msra.mxu0 %vm40_vm0, %v33_v3  ;;  %274 = vmatpush.xpose.msk.msra.mxu2 %vm40_vm0, %v33_v3 }
   0xf   :  { %186 = vmatpush.msra.mxu1 %v30_v6 }
  0x11   :  { %187 = vmatpush.msra.mxu1 %v29_v7 }
  0x12   :  { %253 = vmatpush.xpose.msk.msra.mxu0 %vm40_vm0, %v32_v4  ;;  %275 = vmatpush.xpose.msk.msra.mxu2 %vm40_vm0, %v32_v4 }
  0x13   :  { %188 = vmatpush.msra.mxu1 %v28_v8 }
  0x15   :  { %189 = vmatpush.msra.mxu1 %v27_v9  ;;  %45 = vadd.xlane.f32.xlu0 %v44_v21 }
  0x16   :  { %254 = vmatpush.xpose.msk.msra.mxu0 %vm40_vm0, %v31_v5  ;;  %276 = vmatpush.xpose.msk.msra.mxu2 %vm40_vm0, %v31_v5 }
  0x17   :  { %190 = vmatpush.msra.mxu1 %v26_v10 }
  0x19   :  { %191 = vmatpush.msra.mxu1 %v25_v11 }
  0x1a   :  { %255 = vmatpush.xpose.msk.msra.mxu0 %vm40_vm0, %v30_v6  ;;  %277 = vmatpush.xpose.msk.msra.mxu2 %vm40_vm0, %v30_v6 }
  0x1b   :  { %192 = vmatpush.msra.mxu1 %v24_v12 }
  0x1d   :  { %193 = vmatpush.msra.mxu1 %v23_v13 }
  0x1e   :  { %256 = vmatpush.xpose.msk.msra.mxu0 %vm40_vm0, %v29_v7  ;;  %278 = vmatpush.xpose.msk.msra.mxu2 %vm40_vm0, %v29_v7 }
  0x1f   :  { %194 = vmatpush.msra.mxu1 %v22_v14 }
  0x21   :  { %195 = vmatpush.msra.mxu1 %v21_v15 }
  0x22   :  { %257 = vmatpush.xpose.msk.msra.mxu0 %vm40_vm0, %v28_v8  ;;  %279 = vmatpush.xpose.msk.msra.mxu2 %vm40_vm0, %v28_v8 }
  0x26   :  { %258 = vmatpush.xpose.msk.msra.mxu0 %vm40_vm0, %v27_v9  ;;  %280 = vmatpush.xpose.msk.msra.mxu2 %vm40_vm0, %v27_v9 }
  0x2a   :  { %259 = vmatpush.xpose.msk.msra.mxu0 %vm40_vm0, %v26_v10  ;;  %281 = vmatpush.xpose.msk.msra.mxu2 %vm40_vm0, %v26_v10 }
  0x2e   :  { %260 = vmatpush.xpose.msk.msra.mxu0 %vm40_vm0, %v25_v11  ;;  %282 = vmatpush.xpose.msk.msra.mxu2 %vm40_vm0, %v25_v11 }
  0x32   :  { %261 = vmatpush.xpose.msk.msra.mxu0 %vm40_vm0, %v24_v12  ;;  %283 = vmatpush.xpose.msk.msra.mxu2 %vm40_vm0, %v24_v12 }
  0x36   :  { %262 = vmatpush.xpose.msk.msra.mxu0 %vm40_vm0, %v23_v13  ;;  %284 = vmatpush.xpose.msk.msra.mxu2 %vm40_vm0, %v23_v13 }
  0x3a   :  { %263 = vmatpush.xpose.msk.msra.mxu0 %vm40_vm0, %v22_v14  ;;  %285 = vmatpush.xpose.msk.msra.mxu2 %vm40_vm0, %v22_v14 }
  0x3e   :  { %264 = vmatpush.xpose.msk.msra.mxu0 %vm40_vm0, %v21_v15  ;;  %286 = vmatpush.xpose.msk.msra.mxu2 %vm40_vm0, %v21_v15 }
  0x41   :  { %265 = vmatmul.msk.f32.vlgmr.msra.gmra.mxu0 %vm40_vm0, %v447_v16  ;;  %266 = vmatmul.msk.f32.vlgmr.msra.gmra.mxu2 %vm40_vm0, %v457_v19 }
  0x80   :  { %v43_v22 = vpop.xlane.xlu0 %42 }
  0x81   :  { %v127_v24 = vadd.f32 %v292_v23, %v43_v22 }
  0x88   :  { %v46_v27 = vpop.xlane.xlu0 %45 }
  0x89   :  { %v128_v29 = vadd.f32 %v292_v23, %v46_v27 }
  0xbe   :  { %v118_v25 = vpop.f32.mrf.mxu0 }
  0xbf   :  { %v129_v26 = vmul.f32 2.0, %v118_v25 }
  0xc1   :  { %v131_v28 = vsub.f32 %v127_v24, %v129_v26 }
  0xc3   :  { %133 = vmin.xlane.f32.xlu1 %v131_v28 }
  0xc4   :  { %v121_v30 = vpop.f32.mrf.mxu2 }
  0xc5   :  { %v130_v31 = vmul.f32 2.0, %v121_v30 }
  0xc7   :  { %v132_v32 = vsub.f32 %v128_v29, %v130_v31 }
  0xcb   :  { %135 = vmin.xlane.f32.xlu1 %v132_v32 }
 0x136   :  { %v134_v35 = vpop.xlane.xlu1 %133 }
 0x137   :  { %vm139_vm1 = vcmp.le.f32.partialorder %v131_v28, %v134_v35 }
 0x138   :  { %v141_v36 = vsel %vm139_vm1, %v138_v34, 128 }
 0x139   :  { %v144_v37 = vshra.s32 %v141_v36, 16  ;;  %v143_v43 = vand.u32 65535, %v141_v36 }
 0x13b   :  { %v146_v38 = vcvt.s32.f32 %v144_v37  ;;  %v145_v45 = vcvt.s32.f32 %v143_v43 }
 0x13d   :  { %147 = vmin.xlane.f32.xlu2 %v146_v38 }
 0x13e   :  { %v136_v39 = vpop.xlane.xlu1 %135 }
 0x13f   :  { %vm140_vm2 = vcmp.le.f32.partialorder %v132_v32, %v136_v39 }
 0x140   :  { %v142_v40 = vsel %vm140_vm2, %v138_v34, 128 }
 0x141   :  { %v158_v41 = vshra.s32 %v142_v40, 16  ;;  %v157_v47 = vand.u32 65535, %v142_v40 }
 0x143   :  { %v160_v42 = vcvt.s32.f32 %v158_v41  ;;  %v159_v49 = vcvt.s32.f32 %v157_v47 }
 0x145   :  { %161 = vmin.xlane.f32.xlu2 %v160_v42 }
 0x1b0   :  { %v148_v44 = vpop.xlane.xlu2 %147 }
 0x1b1   :  { %vm149_vm3 = vcmp.eq.f32.partialorder %v146_v38, %v148_v44  ;;  %v154_v51 = vcvt.f32.s32 %v148_v44 }
 0x1b2   :  { %v150_v46 = vsel %vm149_vm3, %v145_v45, inf }
 0x1b3   :  { %151 = vmin.xlane.f32.xlu0 %v150_v46  ;;  %v155_v53 = vshll.u32 %v154_v51, 16 }
 0x1b8   :  { %v162_v48 = vpop.xlane.xlu2 %161 }
 0x1b9   :  { %vm163_vm4 = vcmp.eq.f32.partialorder %v160_v42, %v162_v48  ;;  %v168_v56 = vcvt.f32.s32 %v162_v48 }
 0x1ba   :  { %v164_v50 = vsel %vm163_vm4, %v159_v49, inf }
 0x1bb   :  { %165 = vmin.xlane.f32.xlu1 %v164_v50  ;;  %v169_v59 = vshll.u32 %v168_v56, 16 }
 0x226   :  { %v152_v52 = vpop.xlane.xlu0 %151 }
 0x227   :  { %v153_v54 = vcvt.f32.s32 %v152_v52 }
 0x229   :  { %v156_v55 = vadd.s32 %v155_v53, %v153_v54 }
 0x22b   :  { %172 = vst.msk [vmem:[%s504_s4] sm:$0xff] %vm171_vm5, %v156_v55  ;;  %vm174_vm6 = vcmp.eq.s32.totalorder %v138_v34, %v156_v55 }
 0x22c   :  { %269 = vmatmul.msk.f32.vlgmr.msra.gmra.mxu1 %vm174_vm6, %v345_v57 }
 0x22e   :  { %v166_v58 = vpop.xlane.xlu1 %165 }
 0x22f   :  { %v167_v60 = vcvt.f32.s32 %v166_v58 }
 0x231   :  { %v170_v61 = vadd.s32 %v169_v59, %v167_v60 }
 0x233   :  { %173 = vst.msk [vmem:[%s504_s4 + $0x8] sm:$0xff] %vm171_vm5, %v170_v61  ;;  %vm175_vm7 = vcmp.eq.s32.totalorder %v138_v34, %v170_v61  ;;  %s347_s4 = smov [#allocation4]  }
 0x234   :  { %270 = vmatmul.msk.f32.gmra.mxu1 %vm175_vm7, %v345_v57  ;;  %s231_s12 = sshll.u32 %s347_s4, 4  ;;  %s232_s12 = int_to_ptr.vmem [resolvable:$true] %s231_s12 }
 0x2a9   :  { %v197_v62 = vpop.f32.mrf.mxu1 }
 0x2aa   :  { %203 = vst.msk [vmem:[#allocation2] sm:$0xff] %vm40_vm0, %v197_v62  ;;  %v205_v63 = vsub.f32 %v197_v62, %v447_v16 }
 0x2ac   :  { %v207_v2 = vmul.f32 %v205_v63, %v205_v63 }
 0x2b1   :  { %v200_v0 = vpop.f32.mrf.mxu1 }
 0x2b2   :  { %204 = vst.msk [vmem:[#allocation2 + $0x8] sm:$0xff] %vm40_vm0, %v200_v0  ;;  %v206_v1 = vsub.f32 %v200_v0, %v457_v19 }
 0x2b3   :  { %223 = dma.vmem_to_hbm [thread:$0]  %s216_s8, 256, %s218_s11, [#allocation3], %s348_s16, %s348_s16, %s349_s17  }
 0x2b4   :  { %v208_v3 = vmul.f32 %v206_v1, %v206_v1 }
 0x2b6   :  { %v209_v4 = vadd.f32 %v208_v3, %v207_v2 }
 0x2b8   :  { %210 = vst.msk [vmem:[#allocation4] sm:$0xff] %vm40_vm0, %v209_v4 }
 0x2b9   :  { %236 = dma.vmem_to_hbm [thread:$0]  %s232_s12, 128, %s234_s15, [#allocation5]  }
 0x2ba   :  { %341 = dma.done.wait [#allocation3], 256  }
 0x2bb   :  { %342 = vsyncadd [#allocation3], 4294967040 }
 0x2bc   :  { %343 = dma.done.wait [#allocation5], 128  }
 0x2bd   :  { %344 = vsyncadd [#allocation5], 4294967168 }
 0x2be   :  { %247 = vsyncpa [#allocation3], 1 }
 0x2bf   :  { %248 = vsyncpa [#allocation5], 1 }

</bundles_post_ra>
